<compile_context>
chip_gen: v6e
topology: v6e:2x2x1
jax: 0.10.0
libtpu: 0.0.40
codegen_flags: <defaults>
</compile_context>

<pallas_src>
import functools

import jax
import jax.numpy as jnp
from jax.experimental import pallas as pl
from jax.experimental.pallas import tpu as pltpu


def _router_kernel(x_ref, wt_ref, b_ref, w_out_ref, i_out_ref, *,
                   top_k, num_experts):
    # Linear: (Tt, H) @ (H, E) -> (Tt, E) on the MXU with f32 accumulation.
    logits = jnp.dot(x_ref[...], wt_ref[...],
                     preferred_element_type=jnp.float32)
    logits = logits + b_ref[...].astype(jnp.float32)

    tt = logits.shape[0]
    expert_iota = jax.lax.broadcasted_iota(jnp.int32, (tt, num_experts), 1)

    # Iterative exact top-k: max value (exact f32), then lowest index among
    # the lanes equal to that max (matches lax.top_k / torch.topk tie-break).
    # Both reductions run on the XLU, which is idle in this mem-bound kernel.
    work = logits
    sel_vals = []
    sel_idxs = []
    for j in range(top_k):
        val = jnp.max(work, axis=-1, keepdims=True)                  # (Tt, 1)
        idx = jnp.min(jnp.where(work == val, expert_iota, num_experts),
                      axis=-1, keepdims=True)                        # (Tt, 1)
        sel_vals.append(val)
        sel_idxs.append(idx)
        if j + 1 < top_k:
            work = jnp.where(expert_iota == idx, -jnp.inf, work)

    # Softmax restricted to the k selected logits; the global softmax
    # denominator cancels with the reference's final top-k renormalization.
    v0 = sel_vals[0]                                # top-1 logit == row max
    exps = [jnp.exp(v - v0) for v in sel_vals]
    denom = exps[0]
    for e in exps[1:]:
        denom = denom + e
    inv = pl.reciprocal(denom, approx=False)

    # Build lane-dense (Tt, 128) result blocks and store each output ONCE
    # (unmasked full-block store, contiguous HBM writeback).
    pad_k = w_out_ref.shape[1]
    lane = jax.lax.broadcasted_iota(jnp.int32, (tt, pad_k), 1)
    w_full = jnp.zeros((tt, pad_k), jnp.float32)
    i_full = jnp.zeros((tt, pad_k), jnp.int32)
    for j in range(top_k):
        w_full = jnp.where(lane == j, exps[j] * inv, w_full)
        i_full = jnp.where(lane == j, sel_idxs[j], i_full)
    w_out_ref[...] = w_full.astype(w_out_ref.dtype)
    i_out_ref[...] = i_full


def _choose_token_tile(tokens, hidden, num_experts, pad_k, x_itemsize,
                       w_itemsize, vmem_limit_bytes):
    """Largest token tile such that the resident working set fits VMEM:
    2 double-buffered x slabs + router weight (budgeted conservatively at 2
    copies) + ~4 (tile_t, E) f32 intermediates + 2 double-buffered padded
    output blocks. Rounded to the dtype sublane multiple."""
    sublane = {4: 8, 2: 16, 1: 32}.get(x_itemsize, 8)
    weight_bytes = 2 * hidden * num_experts * w_itemsize
    headroom = 2 * 1024 * 1024
    budget = max(vmem_limit_bytes - weight_bytes - headroom, 1 * 1024 * 1024)
    per_row = (2 * hidden * x_itemsize          # double-buffered x slab
               + 4 * num_experts * 4            # logits / work / temporaries
               + 2 * 2 * pad_k * 4)             # 2 outputs, double-buffered
    t = int(budget // per_row)
    t = max(sublane, min(t, 4096))
    if tokens <= t:
        # One tile covers everything. If it is large, split into two tiles so
        # both v7x TensorCores get work; otherwise keep a single full tile.
        if tokens >= 2048:
            half = -(-tokens // 2)
            return -(-half // sublane) * sublane
        return tokens
    return (t // sublane) * sublane


def router_forward(x, weight, bias, top_k, *, cast_inputs_to_bf16=False):
    """x: (..., H); weight: (E, H); bias: (E,).
    Returns (topk_weight (T, k) float32, topk_idx (T, k) int32)."""
    num_experts, hidden = weight.shape
    assert top_k <= num_experts, "top_k must not exceed num_experts"

    x2d = x.reshape(-1, hidden)
    tokens = x2d.shape[0]
    w_t = weight.T                         # (H, E): one-time transpose outside
    bias2d = bias.reshape(1, num_experts)

    if cast_inputs_to_bf16:
        # ~2x on the HBM roofline; may flip near-tie expert picks vs f32.
        x2d = x2d.astype(jnp.bfloat16)
        w_t = w_t.astype(jnp.bfloat16)

    # Lane-dense output width (>= 128 lanes for unmasked stores).
    pad_k = ((top_k + 127) // 128) * 128

    # Generation-aware scoped-VMEM limit (96 MiB on v5e/v6e, 48 MiB on v7x).
    try:
        phys_vmem = int(pltpu.get_tpu_info().vmem_capacity_bytes)
    except Exception:
        phys_vmem = 64 * 1024 * 1024       # conservative (v7x per-TC physical)
    vmem_limit = min(phys_vmem * 3 // 4, 96 * 1024 * 1024)

    tile_t = _choose_token_tile(tokens, hidden, num_experts, pad_k,
                                x2d.dtype.itemsize, w_t.dtype.itemsize,
                                vmem_limit)
    grid = (pl.cdiv(tokens, tile_t),)

    def build(single_buffer_resident):
        if single_buffer_resident:
            def resident(shape):
                return pl.BlockSpec(shape, lambda i: (0, 0),
                                    pipeline_mode=pl.Buffered(1))
        else:
            def resident(shape):
                return pl.BlockSpec(shape, lambda i: (0, 0))
        return pl.pallas_call(
            functools.partial(_router_kernel, top_k=top_k,
                              num_experts=num_experts),
            out_shape=(
                jax.ShapeDtypeStruct((tokens, pad_k), jnp.float32),
                jax.ShapeDtypeStruct((tokens, pad_k), jnp.int32),
            ),
            grid=grid,
            in_specs=[
                # x: tiled over tokens, auto double-buffered/pipelined.
                pl.BlockSpec((tile_t, hidden), lambda i: (i, 0)),
                # weight / bias: VMEM-resident, constant index_map.
                resident((hidden, num_experts)),
                resident((1, num_experts)),
            ],
            out_specs=(
                pl.BlockSpec((tile_t, pad_k), lambda i: (i, 0)),
                pl.BlockSpec((tile_t, pad_k), lambda i: (i, 0)),
            ),
            compiler_params=pltpu.CompilerParams(
                dimension_semantics=("parallel",),   # split tiles on v7x TCs
                vmem_limit_bytes=int(vmem_limit),
            ),
        )

    try:
        w_pad, i_pad = build(True)(x2d, w_t, bias2d)
    except Exception:
        # Fallback for JAX builds without BlockSpec(pipeline_mode=...) /
        # Buffered(1): default double-buffered resident operands.
        w_pad, i_pad = build(False)(x2d, w_t, bias2d)

    return w_pad[:, :top_k], i_pad[:, :top_k]


if __name__ == "__main__":
    # Small shapes consistent with the module's forward.
    batch, seq, hidden = 2, 8, 32
    num_experts, top_k = 8, 2

    key = jax.random.PRNGKey(0)
    kx, kw, kb = jax.random.split(key, 3)

    x = jax.random.normal(kx, (batch, seq, hidden), dtype=jnp.float32)
    # Deterministic parameter init (nn.Linear-like uniform bound 1/sqrt(H)).
    bound = 1.0 / (hidden ** 0.5)
    weight = jax.random.uniform(kw, (num_experts, hidden), jnp.float32,
                                -bound, bound)
    bias = jax.random.uniform(kb, (num_experts,), jnp.float32, -bound, bound)

    topk_w, topk_idx = router_forward(x, weight, bias, top_k)
    topk_w = jax.block_until_ready(topk_w)
    topk_idx = jax.block_until_ready(topk_idx)

    # Pure-JAX reference check (same semantics as the PyTorch module).
    logits = x.reshape(-1, hidden) @ weight.T + bias
    probs = jax.nn.softmax(logits, axis=-1)
    ref_w, ref_i = jax.lax.top_k(probs, top_k)
    ref_w = ref_w / jnp.sum(ref_w, axis=-1, keepdims=True)
    assert jnp.allclose(topk_w, ref_w, atol=1e-5), "weights mismatch"
    assert jnp.array_equal(topk_idx, ref_i), "indices mismatch"

    print("KERNEL_OK")
</pallas_src>

<mosaic_0001>
module attributes {stable_mosaic.version = 11 : i64} {
  func.func @_router_kernel(%arg0: i32, %arg1: memref<16x32xf32, #tpu.memory_space<vmem>>, %arg2: memref<32x8xf32, #tpu.memory_space<vmem>>, %arg3: memref<1x8xf32, #tpu.memory_space<vmem>>, %arg4: memref<16x128xf32, #tpu.memory_space<vmem>>, %arg5: memref<16x128xi32, #tpu.memory_space<vmem>>) attributes {dimension_semantics = [#tpu.dimension_semantics<parallel>], iteration_bounds = array<i64: 1>, scalar_prefetch = 0 : i64, scratch_operands = 0 : i64, tpu.core_type = #tpu.core_type<tc>, window_params = [{transform_indices = @transform_0, window_bounds = array<i64: 16, 32>}, {pipeline_mode = #tpu.pipeline_mode<synchronous>, transform_indices = @transform_1, window_bounds = array<i64: 32, 8>}, {pipeline_mode = #tpu.pipeline_mode<synchronous>, transform_indices = @transform_2, window_bounds = array<i64: 1, 8>}, {transform_indices = @transform_3, window_bounds = array<i64: 16, 128>}, {transform_indices = @transform_4, window_bounds = array<i64: 16, 128>}]} {
    %c0 = arith.constant 0 : index
    %c0_0 = arith.constant 0 : index
    %0 = vector.load %arg1[%c0, %c0_0] : memref<16x32xf32, #tpu.memory_space<vmem>>, vector<16x32xf32>
    %c0_1 = arith.constant 0 : index
    %c0_2 = arith.constant 0 : index
    %1 = vector.load %arg2[%c0_1, %c0_2] : memref<32x8xf32, #tpu.memory_space<vmem>>, vector<32x8xf32>
    %cst = arith.constant dense<0.000000e+00> : vector<16x8xf32>
    %2 = tpu.matmul %0, %1, %cst {dimension_numbers = #tpu.dot_dimension_numbers<[1], [0], [0], [1], [0, 0, 1, 1], [], []>} : vector<16x32xf32>, vector<32x8xf32>, vector<16x8xf32> -> vector<16x8xf32>
    %c0_3 = arith.constant 0 : index
    %c0_4 = arith.constant 0 : index
    %3 = vector.load %arg3[%c0_3, %c0_4] : memref<1x8xf32, #tpu.memory_space<vmem>>, vector<1x8xf32>
    %4 = vector.broadcast %3 : vector<1x8xf32> to vector<16x8xf32>
    %5 = arith.addf %2, %4 : vector<16x8xf32>
    %6 = tpu.iota {dimensions = array<i32: 1>} : vector<16x8xi32>
    %cst_5 = arith.constant dense<0xFF800000> : vector<16xf32>
    %7 = vector.multi_reduction <maximumf>, %5, %cst_5 [1] : vector<16x8xf32> to vector<16xf32>
    %8 = vector.shape_cast %7 : vector<16xf32> to vector<16x1xf32>
    %9 = vector.broadcast %8 : vector<16x1xf32> to vector<16x8xf32>
    %10 = arith.cmpf oeq, %5, %9 : vector<16x8xf32>
    %c8_i32 = arith.constant 8 : i32
    %11 = vector.broadcast %c8_i32 : i32 to vector<16x8xi32>
    %12 = arith.select %10, %6, %11 : vector<16x8xi1>, vector<16x8xi32>
    %cst_6 = arith.constant dense<2147483647> : vector<16xi32>
    %13 = vector.multi_reduction <minsi>, %12, %cst_6 [1] : vector<16x8xi32> to vector<16xi32>
    %14 = vector.shape_cast %13 : vector<16xi32> to vector<16x1xi32>
    %15 = vector.broadcast %14 : vector<16x1xi32> to vector<16x8xi32>
    %16 = arith.cmpi eq, %6, %15 : vector<16x8xi32>
    %cst_7 = arith.constant 0xFF800000 : f32
    %17 = vector.broadcast %cst_7 : f32 to vector<16x8xf32>
    %18 = arith.select %16, %17, %5 : vector<16x8xi1>, vector<16x8xf32>
    %cst_8 = arith.constant dense<0xFF800000> : vector<16xf32>
    %19 = vector.multi_reduction <maximumf>, %18, %cst_8 [1] : vector<16x8xf32> to vector<16xf32>
    %20 = vector.shape_cast %19 : vector<16xf32> to vector<16x1xf32>
    %21 = vector.broadcast %20 : vector<16x1xf32> to vector<16x8xf32>
    %22 = arith.cmpf oeq, %18, %21 : vector<16x8xf32>
    %c8_i32_9 = arith.constant 8 : i32
    %23 = vector.broadcast %c8_i32_9 : i32 to vector<16x8xi32>
    %24 = arith.select %22, %6, %23 : vector<16x8xi1>, vector<16x8xi32>
    %cst_10 = arith.constant dense<2147483647> : vector<16xi32>
    %25 = vector.multi_reduction <minsi>, %24, %cst_10 [1] : vector<16x8xi32> to vector<16xi32>
    %26 = vector.shape_cast %25 : vector<16xi32> to vector<16x1xi32>
    %27 = arith.subf %8, %8 : vector<16x1xf32>
    %28 = math.exp %27 : vector<16x1xf32>
    %29 = arith.subf %20, %8 : vector<16x1xf32>
    %30 = math.exp %29 : vector<16x1xf32>
    %31 = arith.addf %28, %30 : vector<16x1xf32>
    %32 = tpu.reciprocal %31 : vector<16x1xf32> -> vector<16x1xf32>
    %33 = tpu.iota {dimensions = array<i32: 1>} : vector<16x128xi32>
    %cst_11 = arith.constant 0.000000e+00 : f32
    %34 = vector.broadcast %cst_11 : f32 to vector<16x128xf32>
    %c0_i32 = arith.constant 0 : i32
    %35 = vector.broadcast %c0_i32 : i32 to vector<16x128xi32>
    %c0_i32_12 = arith.constant 0 : i32
    %36 = vector.broadcast %c0_i32_12 : i32 to vector<16x128xi32>
    %37 = arith.cmpi eq, %33, %36 : vector<16x128xi32>
    %38 = arith.mulf %28, %32 : vector<16x1xf32>
    %39 = vector.shape_cast %38 : vector<16x1xf32> to vector<16x1xf32>
    %40 = vector.broadcast %39 : vector<16x1xf32> to vector<16x128xf32>
    %41 = arith.select %37, %40, %34 : vector<16x128xi1>, vector<16x128xf32>
    %c0_i32_13 = arith.constant 0 : i32
    %42 = vector.broadcast %c0_i32_13 : i32 to vector<16x128xi32>
    %43 = arith.cmpi eq, %33, %42 : vector<16x128xi32>
    %44 = vector.shape_cast %14 : vector<16x1xi32> to vector<16x1xi32>
    %45 = vector.broadcast %44 : vector<16x1xi32> to vector<16x128xi32>
    %46 = arith.select %43, %45, %35 : vector<16x128xi1>, vector<16x128xi32>
    %c1_i32 = arith.constant 1 : i32
    %47 = vector.broadcast %c1_i32 : i32 to vector<16x128xi32>
    %48 = arith.cmpi eq, %33, %47 : vector<16x128xi32>
    %49 = arith.mulf %30, %32 : vector<16x1xf32>
    %50 = vector.shape_cast %49 : vector<16x1xf32> to vector<16x1xf32>
    %51 = vector.broadcast %50 : vector<16x1xf32> to vector<16x128xf32>
    %52 = arith.select %48, %51, %41 : vector<16x128xi1>, vector<16x128xf32>
    %c1_i32_14 = arith.constant 1 : i32
    %53 = vector.broadcast %c1_i32_14 : i32 to vector<16x128xi32>
    %54 = arith.cmpi eq, %33, %53 : vector<16x128xi32>
    %55 = vector.shape_cast %26 : vector<16x1xi32> to vector<16x1xi32>
    %56 = vector.broadcast %55 : vector<16x1xi32> to vector<16x128xi32>
    %57 = arith.select %54, %56, %46 : vector<16x128xi1>, vector<16x128xi32>
    %c0_15 = arith.constant 0 : index
    %c0_16 = arith.constant 0 : index
    %58 = vector.load %arg4[%c0_15, %c0_16] : memref<16x128xf32, #tpu.memory_space<vmem>>, vector<16x128xf32>
    tpu.vector_store %arg4[%c0_15, %c0_16], %52 {strides = array<i32>} : memref<16x128xf32, #tpu.memory_space<vmem>>, vector<16x128xf32>,
    %c0_17 = arith.constant 0 : index
    %c0_18 = arith.constant 0 : index
    %59 = vector.load %arg5[%c0_17, %c0_18] : memref<16x128xi32, #tpu.memory_space<vmem>>, vector<16x128xi32>
    tpu.vector_store %arg5[%c0_17, %c0_18], %57 {strides = array<i32>} : memref<16x128xi32, #tpu.memory_space<vmem>>, vector<16x128xi32>,
    return
  }
  func.func @transform_0(%arg0: i32) -> (i32, i32) {
    %c0_i32 = arith.constant 0 : i32
    %c0_i32_0 = arith.constant 0 : i32
    return %arg0, %c0_i32 : i32, i32
  }
  func.func @transform_1(%arg0: i32) -> (i32, i32) {
    %c0_i32 = arith.constant 0 : i32
    %c0_i32_0 = arith.constant 0 : i32
    %c0_i32_1 = arith.constant 0 : i32
    return %c0_i32, %c0_i32_0 : i32, i32
  }
  func.func @transform_2(%arg0: i32) -> (i32, i32) {
    %c0_i32 = arith.constant 0 : i32
    %c0_i32_0 = arith.constant 0 : i32
    %c0_i32_1 = arith.constant 0 : i32
    return %c0_i32, %c0_i32_0 : i32, i32
  }
  func.func @transform_3(%arg0: i32) -> (i32, i32) {
    %c0_i32 = arith.constant 0 : i32
    %c0_i32_0 = arith.constant 0 : i32
    return %arg0, %c0_i32 : i32, i32
  }
  func.func @transform_4(%arg0: i32) -> (i32, i32) {
    %c0_i32 = arith.constant 0 : i32
    %c0_i32_0 = arith.constant 0 : i32
    return %arg0, %c0_i32 : i32, i32
  }
}

module attributes {stable_mosaic.version = 11 : i64} {
  func.func @_router_kernel(%arg0: i32, %arg1: memref<16x32xf32, #tpu.memory_space<vmem>>, %arg2: memref<32x8xf32, #tpu.memory_space<vmem>>, %arg3: memref<1x8xf32, #tpu.memory_space<vmem>>, %arg4: memref<16x128xf32, #tpu.memory_space<vmem>>, %arg5: memref<16x128xi32, #tpu.memory_space<vmem>>) attributes {dimension_semantics = [#tpu.dimension_semantics<parallel>], iteration_bounds = array<i64: 1>, scalar_prefetch = 0 : i64, scratch_operands = 0 : i64, tpu.core_type = #tpu.core_type<tc>, window_params = [{transform_indices = @transform_0, window_bounds = array<i64: 16, 32>}, {pipeline_mode = #tpu.pipeline_mode<synchronous>, transform_indices = @transform_1, window_bounds = array<i64: 32, 8>}, {pipeline_mode = #tpu.pipeline_mode<synchronous>, transform_indices = @transform_2, window_bounds = array<i64: 1, 8>}, {transform_indices = @transform_3, window_bounds = array<i64: 16, 128>}, {transform_indices = @transform_4, window_bounds = array<i64: 16, 128>}]} {
    %c0 = arith.constant 0 : index
    %c0_0 = arith.constant 0 : index
    %0 = vector.load %arg1[%c0, %c0_0] : memref<16x32xf32, #tpu.memory_space<vmem>>, vector<16x32xf32>
    %c0_1 = arith.constant 0 : index
    %c0_2 = arith.constant 0 : index
    %1 = vector.load %arg2[%c0_1, %c0_2] : memref<32x8xf32, #tpu.memory_space<vmem>>, vector<32x8xf32>
    %cst = arith.constant dense<0.000000e+00> : vector<16x8xf32>
    %2 = tpu.matmul %0, %1, %cst {dimension_numbers = #tpu.dot_dimension_numbers<[1], [0], [0], [1], [0, 0, 1, 1], [], []>} : vector<16x32xf32>, vector<32x8xf32>, vector<16x8xf32> -> vector<16x8xf32>
    %c0_3 = arith.constant 0 : index
    %c0_4 = arith.constant 0 : index
    %3 = vector.load %arg3[%c0_3, %c0_4] : memref<1x8xf32, #tpu.memory_space<vmem>>, vector<1x8xf32>
    %4 = vector.broadcast %3 : vector<1x8xf32> to vector<16x8xf32>
    %5 = arith.addf %2, %4 : vector<16x8xf32>
    %6 = tpu.iota {dimensions = array<i32: 1>} : vector<16x8xi32>
    %cst_5 = arith.constant dense<0xFF800000> : vector<16xf32>
    %7 = vector.multi_reduction <maximumf>, %5, %cst_5 [1] : vector<16x8xf32> to vector<16xf32>
    %8 = vector.shape_cast %7 : vector<16xf32> to vector<16x1xf32>
    %9 = vector.broadcast %8 : vector<16x1xf32> to vector<16x8xf32>
    %10 = arith.cmpf oeq, %5, %9 : vector<16x8xf32>
    %c8_i32 = arith.constant 8 : i32
    %11 = vector.broadcast %c8_i32 : i32 to vector<16x8xi32>
    %12 = arith.select %10, %6, %11 : vector<16x8xi1>, vector<16x8xi32>
    %cst_6 = arith.constant dense<2147483647> : vector<16xi32>
    %13 = vector.multi_reduction <minsi>, %12, %cst_6 [1] : vector<16x8xi32> to vector<16xi32>
    %14 = vector.shape_cast %13 : vector<16xi32> to vector<16x1xi32>
    %15 = vector.broadcast %14 : vector<16x1xi32> to vector<16x8xi32>
    %16 = arith.cmpi eq, %6, %15 : vector<16x8xi32>
    %cst_7 = arith.constant 0xFF800000 : f32
    %17 = vector.broadcast %cst_7 : f32 to vector<16x8xf32>
    %18 = arith.select %16, %17, %5 : vector<16x8xi1>, vector<16x8xf32>
    %cst_8 = arith.constant dense<0xFF800000> : vector<16xf32>
    %19 = vector.multi_reduction <maximumf>, %18, %cst_8 [1] : vector<16x8xf32> to vector<16xf32>
    %20 = vector.shape_cast %19 : vector<16xf32> to vector<16x1xf32>
    %21 = vector.broadcast %20 : vector<16x1xf32> to vector<16x8xf32>
    %22 = arith.cmpf oeq, %18, %21 : vector<16x8xf32>
    %c8_i32_9 = arith.constant 8 : i32
    %23 = vector.broadcast %c8_i32_9 : i32 to vector<16x8xi32>
    %24 = arith.select %22, %6, %23 : vector<16x8xi1>, vector<16x8xi32>
    %cst_10 = arith.constant dense<2147483647> : vector<16xi32>
    %25 = vector.multi_reduction <minsi>, %24, %cst_10 [1] : vector<16x8xi32> to vector<16xi32>
    %26 = vector.shape_cast %25 : vector<16xi32> to vector<16x1xi32>
    %27 = arith.subf %8, %8 : vector<16x1xf32>
    %28 = math.exp %27 : vector<16x1xf32>
    %29 = arith.subf %20, %8 : vector<16x1xf32>
    %30 = math.exp %29 : vector<16x1xf32>
    %31 = arith.addf %28, %30 : vector<16x1xf32>
    %32 = tpu.reciprocal %31 : vector<16x1xf32> -> vector<16x1xf32>
    %33 = tpu.iota {dimensions = array<i32: 1>} : vector<16x128xi32>
    %cst_11 = arith.constant 0.000000e+00 : f32
    %34 = vector.broadcast %cst_11 : f32 to vector<16x128xf32>
    %c0_i32 = arith.constant 0 : i32
    %35 = vector.broadcast %c0_i32 : i32 to vector<16x128xi32>
    %c0_i32_12 = arith.constant 0 : i32
    %36 = vector.broadcast %c0_i32_12 : i32 to vector<16x128xi32>
    %37 = arith.cmpi eq, %33, %36 : vector<16x128xi32>
    %38 = arith.mulf %28, %32 : vector<16x1xf32>
    %39 = vector.shape_cast %38 : vector<16x1xf32> to vector<16x1xf32>
    %40 = vector.broadcast %39 : vector<16x1xf32> to vector<16x128xf32>
    %41 = arith.select %37, %40, %34 : vector<16x128xi1>, vector<16x128xf32>
    %c0_i32_13 = arith.constant 0 : i32
    %42 = vector.broadcast %c0_i32_13 : i32 to vector<16x128xi32>
    %43 = arith.cmpi eq, %33, %42 : vector<16x128xi32>
    %44 = vector.shape_cast %14 : vector<16x1xi32> to vector<16x1xi32>
    %45 = vector.broadcast %44 : vector<16x1xi32> to vector<16x128xi32>
    %46 = arith.select %43, %45, %35 : vector<16x128xi1>, vector<16x128xi32>
    %c1_i32 = arith.constant 1 : i32
    %47 = vector.broadcast %c1_i32 : i32 to vector<16x128xi32>
    %48 = arith.cmpi eq, %33, %47 : vector<16x128xi32>
    %49 = arith.mulf %30, %32 : vector<16x1xf32>
    %50 = vector.shape_cast %49 : vector<16x1xf32> to vector<16x1xf32>
    %51 = vector.broadcast %50 : vector<16x1xf32> to vector<16x128xf32>
    %52 = arith.select %48, %51, %41 : vector<16x128xi1>, vector<16x128xf32>
    %c1_i32_14 = arith.constant 1 : i32
    %53 = vector.broadcast %c1_i32_14 : i32 to vector<16x128xi32>
    %54 = arith.cmpi eq, %33, %53 : vector<16x128xi32>
    %55 = vector.shape_cast %26 : vector<16x1xi32> to vector<16x1xi32>
    %56 = vector.broadcast %55 : vector<16x1xi32> to vector<16x128xi32>
    %57 = arith.select %54, %56, %46 : vector<16x128xi1>, vector<16x128xi32>
    %c0_15 = arith.constant 0 : index
    %c0_16 = arith.constant 0 : index
    %58 = vector.load %arg4[%c0_15, %c0_16] : memref<16x128xf32, #tpu.memory_space<vmem>>, vector<16x128xf32>
    tpu.vector_store %arg4[%c0_15, %c0_16], %52 {strides = array<i32>} : memref<16x128xf32, #tpu.memory_space<vmem>>, vector<16x128xf32>,
    %c0_17 = arith.constant 0 : index
    %c0_18 = arith.constant 0 : index
    %59 = vector.load %arg5[%c0_17, %c0_18] : memref<16x128xi32, #tpu.memory_space<vmem>>, vector<16x128xi32>
    tpu.vector_store %arg5[%c0_17, %c0_18], %57 {strides = array<i32>} : memref<16x128xi32, #tpu.memory_space<vmem>>, vector<16x128xi32>,
    return
  }
  func.func @transform_0(%arg0: i32) -> (i32, i32) {
    %c0_i32 = arith.constant 0 : i32
    %c0_i32_0 = arith.constant 0 : i32
    return %arg0, %c0_i32 : i32, i32
  }
  func.func @transform_1(%arg0: i32) -> (i32, i32) {
    %c0_i32 = arith.constant 0 : i32
    %c0_i32_0 = arith.constant 0 : i32
    %c0_i32_1 = arith.constant 0 : i32
    return %c0_i32, %c0_i32_0 : i32, i32
  }
  func.func @transform_2(%arg0: i32) -> (i32, i32) {
    %c0_i32 = arith.constant 0 : i32
    %c0_i32_0 = arith.constant 0 : i32
    %c0_i32_1 = arith.constant 0 : i32
    return %c0_i32, %c0_i32_0 : i32, i32
  }
  func.func @transform_3(%arg0: i32) -> (i32, i32) {
    %c0_i32 = arith.constant 0 : i32
    %c0_i32_0 = arith.constant 0 : i32
    return %arg0, %c0_i32 : i32, i32
  }
  func.func @transform_4(%arg0: i32) -> (i32, i32) {
    %c0_i32 = arith.constant 0 : i32
    %c0_i32_0 = arith.constant 0 : i32
    return %arg0, %c0_i32 : i32, i32
  }
}

</mosaic_0001>

<bundles_post_ra>
// kernel: tpu_custom_call.1
= control target key start
LH: loop header
LB: loop body
LE: loop exit
PB: predicated region body
PF: predicated region fallthrough
CT: control target
= control target key end

     0   :  { %10 = vsyncpa [#allocation3], 0  ;;  %vm31_vm0 = vcmask 261120   ;;  %s450_s0 = inlined_call_operand.vmem [shape: f32[16,32], index: 0, kind: input, shape index: {}]   ;;  %s451_s1 = inlined_call_operand.vmem [shape: f32[32,8], index: 1, kind: input, shape index: {}]   ;;  %s452_s2 = inlined_call_operand.vmem [shape: f32[1,8], index: 2, kind: input, shape index: {}]   ;;  %s453_s3 = inlined_call_operand.hbm [shape: f32[16,128], index: 3, kind: output, shape index: {0}]   ;;  %s454_s4 = inlined_call_operand.hbm [shape: s32[16,128], index: 4, kind: output, shape index: {1}]  }
   0x1   :  { %v23_v0 = vld [vmem:[%s451_s1 + $0x18] sm:$0xff]  ;;  %v22_v1 = vld [vmem:[%s451_s1 + $0x10] sm:$0xff]  ;;  %v18_v2 = vld [vmem:[%s450_s0] sm:$0xff] }
   0x2   :  { %275 = vmatprep.subr.mxu0 %v23_v0  ;;  %v21_v3 = vld [vmem:[%s451_s1 + $0x8] sm:$0xff]  ;;  %283 = vmatprep.mubr.msk.f32.mxu0 %vm31_vm0, %v18_v2 }
   0x3   :  { %276 = vmatpush3.msra.mxu0 %v23_v0 }
   0x4   :  { %11 = vsyncpa [#allocation5], 0  ;;  %277 = vmatprep.subr.mxu0 %v22_v1  ;;  %v20_v4 = vld [vmem:[%s451_s1] sm:$0xff]  ;;  %v19_v5 = vld [vmem:[%s450_s0 + $0x8] sm:$0xff]  ;;  %vm115_vm1 = vcmask 64512   ;;  %v113_v13 = vlaneseq  ;;  %s346_s0 = smov [#allocation2]  }
   0x5   :  { %278 = vmatpush3.msra.mxu0 %v22_v1  ;;  %v266_v7 = vld [vmem:[%s452_s2] ss:$0 sm:$0xff]  ;;  %s239_s1 = sshll.u32 %s346_s0, 4  ;;  %s240_s1 = int_to_ptr.vmem [resolvable:$true] %s239_s1 }
   0x6   :  { %279 = vmatprep.subr.mxu0 %v21_v3  ;;  %v398_v14 = vand.u32 127, %v113_v13  ;;  %s302_s2 = scalar_lea.vmem %s240_s1, 256  ;;  %p307_p1 = scmp.lt.s32.totalorder %s240_s1, %s240_s1 }
   0x7   :  { %280 = vmatpush3.msra.mxu0 %v21_v3  ;;  %p303_p0 = scmp.ne.s32.totalorder %s240_s1, %s302_s2  ;;  %p308_p2 = scmp.lt.s32.totalorder %s302_s2, %s302_s2 }
   0x8   :  { %281 = vmatprep.subr.mxu0 %v20_v4  ;;  %vm223_vm10 = vcmp.eq.s32.totalorder %v398_v14, 1  ;;  %vm216_vm11 = vcmp.eq.s32.totalorder %v398_v14, 0 }
   0x9   :  { %282 = vmatpush3.msra.mxu0 %v20_v4  ;;  %p309_p3 = por %p308_p2, %p307_p1 }
   0xa   :  { %284 = vmatmul.mubr.msk.f32.vlgmr.msra.gmra.mxu0 %vm31_vm0, %v19_v5 }
   0xb   :  { %p310_p4 = pnand %p309_p3, %p303_p0 }
  0xca   :  { %v285_v6 = vpop.f32.mrf.mxu0 }
  0xcb   :  { %v110_v10 = vadd.f32 %v285_v6, %v266_v7 }
  0xcc   :  { %v104_v8 = vpop.f32.mrf.mxu0 }
  0xcd   :  { %v105_v9 = vadd.f32 %v266_v7, %v104_v8  ;;  %v119_v12 = vsel %vm115_vm1, %v110_v10, -inf }
  0xcf   :  { %v116_v11 = vsel %vm115_vm1, %v105_v9, -inf }
  0xd0   :  { %117 = vmax.xlane.f32.xlu0 %v116_v11 }
  0xd4   :  { %120 = vmax.xlane.f32.xlu0 %v119_v12 }
 0x159   :  { %v118_v15 = vpop.xlane.xlu0 %117 }
 0x15a   :  { %vm122_vm2 = vcmp.eq.f32.partialorder %v105_v9, %v118_v15  ;;  %v200_v47 = vsub.f32 %v118_v15, %v118_v15 }
 0x15b   :  { %v124_v16 = vsel %vm122_vm2, %v398_v14, 8 }
 0x15c   :  { %v126_v17 = vsel %vm115_vm1, %v124_v16, 2147483647  ;;  %v202_v48 = vmul.f32 1.442695, %v200_v47 }
 0x15d   :  { %v121_v18 = vpop.xlane.xlu0 %120  ;;  %v128_v19 = vshra.s32 %v126_v17, 16  ;;  %v127_v25 = vand.u32 65535, %v126_v17 }
 0x15e   :  { %vm123_vm3 = vcmp.eq.f32.partialorder %v110_v10, %v121_v18  ;;  %v201_v49 = vsub.f32 %v121_v18, %v121_v18  ;;  %290 = vpow2.f32 %v202_v48 }
 0x15f   :  { %v130_v20 = vcvt.s32.f32 %v128_v19  ;;  %v125_v21 = vsel %vm123_vm3, %v398_v14, 8  ;;  %v129_v27 = vcvt.s32.f32 %v127_v25 }
 0x160   :  { %v141_v22 = vsel %vm115_vm1, %v125_v21, 2147483647  ;;  %v204_v55 = vmul.f32 1.442695, %v201_v49 }
 0x161   :  { %131 = vmin.xlane.f32.xlu1 %v130_v20  ;;  %v143_v23 = vshra.s32 %v141_v22, 16  ;;  %v142_v28 = vand.u32 65535, %v141_v22 }
 0x163   :  { %v145_v24 = vcvt.s32.f32 %v143_v23  ;;  %v144_v31 = vcvt.s32.f32 %v142_v28 }
 0x165   :  { %146 = vmin.xlane.f32.xlu1 %v145_v24 }
 0x16b   :  { %v291_v1 = vpop.eup %290 }
 0x1ea   :  { %v132_v26 = vpop.xlane.xlu1 %131 }
 0x1eb   :  { %vm133_vm4 = vcmp.eq.f32.partialorder %v130_v20, %v132_v26  ;;  %v138_v33 = vcvt.f32.s32 %v132_v26 }
 0x1ec   :  { %v134_v29 = vsel %vm133_vm4, %v129_v27, inf }
 0x1ed   :  { %135 = vmin.xlane.f32.xlu0 %v134_v29  ;;  %v139_v35 = vshll.u32 %v138_v33, 16 }
 0x1ee   :  { %v147_v30 = vpop.xlane.xlu1 %146 }
 0x1ef   :  { %vm148_vm5 = vcmp.eq.f32.partialorder %v145_v24, %v147_v30  ;;  %v153_v36 = vcvt.f32.s32 %v147_v30 }
 0x1f0   :  { %v149_v32 = vsel %vm148_vm5, %v144_v31, inf }
 0x1f1   :  { %150 = vmin.xlane.f32.xlu1 %v149_v32  ;;  %v154_v40 = vshll.u32 %v153_v36, 16 }
 0x276   :  { %v136_v34 = vpop.xlane.xlu0 %135 }
 0x277   :  { %v137_v37 = vcvt.f32.s32 %v136_v34 }
 0x279   :  { %v404_v38 = vadd.s32 %v139_v35, %v137_v37 }
 0x27a   :  { %v151_v39 = vpop.xlane.xlu1 %150 }
 0x27b   :  { %v152_v41 = vcvt.f32.s32 %v151_v39  ;;  %vm156_vm6 = vcmp.eq.s32.totalorder %v398_v14, %v404_v38 }
 0x27c   :  { %v158_v42 = vsel %vm156_vm6, -inf, %v105_v9 }
 0x27d   :  { %v408_v43 = vadd.s32 %v154_v40, %v152_v41  ;;  %v160_v44 = vsel %vm115_vm1, %v158_v42, -inf }
 0x27e   :  { %161 = vmax.xlane.f32.xlu0 %v160_v44 }
 0x27f   :  { %vm157_vm7 = vcmp.eq.s32.totalorder %v398_v14, %v408_v43 }
 0x280   :  { %v159_v45 = vsel %vm157_vm7, -inf, %v110_v10 }
 0x281   :  { %v163_v46 = vsel %vm115_vm1, %v159_v45, -inf }
 0x282   :  { %164 = vmax.xlane.f32.xlu1 %v163_v46 }
 0x307   :  { %v162_v50 = vpop.xlane.xlu0 %161 }
 0x308   :  { %vm166_vm8 = vcmp.eq.f32.partialorder %v158_v42, %v162_v50  ;;  %v206_v51 = vsub.f32 %v162_v50, %v118_v15 }
 0x309   :  { %v168_v52 = vsel %vm166_vm8, %v398_v14, 8 }
 0x30a   :  { %v208_v53 = vmul.f32 1.442695, %v206_v51  ;;  %v170_v54 = vsel %vm115_vm1, %v168_v52, 2147483647 }
 0x30b   :  { %v165_v56 = vpop.xlane.xlu1 %164  ;;  %v172_v57 = vshra.s32 %v170_v54, 16 }
 0x30c   :  { %292 = vpow2.f32 %v208_v53  ;;  %vm167_vm9 = vcmp.eq.f32.partialorder %v159_v45, %v165_v56  ;;  %v207_v58 = vsub.f32 %v165_v56, %v121_v18  ;;  %v171_v18 = vand.u32 65535, %v170_v54 }
 0x30d   :  { %v169_v59 = vsel %vm167_vm9, %v398_v14, 8  ;;  %v174_v60 = vcvt.s32.f32 %v172_v57  ;;  %294 = vpow2.f32 %v204_v55 }
 0x30e   :  { %v210_v61 = vmul.f32 1.442695, %v207_v58  ;;  %v185_v62 = vsel %vm115_vm1, %v169_v59, 2147483647  ;;  %v173_v20 = vcvt.s32.f32 %v171_v18 }
 0x30f   :  { %175 = vmin.xlane.f32.xlu0 %v174_v60  ;;  %v187_v63 = vshra.s32 %v185_v62, 16  ;;  %v186_v21 = vand.u32 65535, %v185_v62 }
 0x310   :  { %296 = vpow2.f32 %v210_v61 }
 0x311   :  { %v189_v0 = vcvt.s32.f32 %v187_v63  ;;  %v188_v24 = vcvt.s32.f32 %v186_v21 }
 0x313   :  { %190 = vmin.xlane.f32.xlu1 %v189_v0 }
 0x319   :  { %v293_v2 = vpop.eup %292 }
 0x31a   :  { %v212_v3 = vadd.f32 %v293_v2, %v291_v1  ;;  %v295_v4 = vpop.eup %294 }
 0x31c   :  { %298 = vrcp.f32 %v212_v3 }
 0x31d   :  { %v297_v5 = vpop.eup %296 }
 0x31e   :  { %v213_v6 = vadd.f32 %v297_v5, %v295_v4 }
 0x320   :  { %300 = vrcp.f32 %v213_v6 }
 0x329   :  { %v299_v7 = vpop.eup %298 }
 0x32a   :  { %v217_v8 = vmul.f32 %v299_v7, %v291_v1  ;;  %v224_v9 = vmul.f32 %v299_v7, %v293_v2 }
 0x32c   :  { %v219_v10 = vsel %vm216_vm11, %v217_v8, 0.0 }
 0x32d   :  { %v301_v11 = vpop.eup %300  ;;  %v226_v12 = vsel %vm223_vm10, %v224_v9, %v219_v10 }
 0x32e   :  { %v218_v13 = vmul.f32 %v301_v11, %v295_v4  ;;  %v225_v15 = vmul.f32 %v301_v11, %v297_v5  ;;  %230 = vst [vmem:[#allocation2] sm:$0xff] %v226_v12 }
 0x330   :  { %v220_v16 = vsel %vm216_vm11, %v218_v13, 0.0 }
 0x331   :  { %v227_v17 = vsel %vm223_vm10, %v225_v15, %v220_v16 }
 0x332   :  { %231 = vst [vmem:[#allocation2 + $0x8] sm:$0xff] %v227_v17 }
 0x398   :  { %v176_v19 = vpop.xlane.xlu0 %175 }
 0x399   :  { %vm177_vm12 = vcmp.eq.f32.partialorder %v174_v60, %v176_v19 }
 0x39a   :  { %v178_v22 = vsel %vm177_vm12, %v173_v20, inf }
 0x39b   :  { %179 = vmin.xlane.f32.xlu0 %v178_v22 }
 0x39c   :  { %v191_v23 = vpop.xlane.xlu1 %190 }
 0x39d   :  { %vm192_vm13 = vcmp.eq.f32.partialorder %v189_v0, %v191_v23 }
 0x39e   :  { %v193_v25 = vsel %vm192_vm13, %v188_v24, inf }
 0x39f   :  { %194 = vmin.xlane.f32.xlu1 %v193_v25 }
 0x3a0   :  { %313 = shalt.err (!%p310_p4)
}
 0x3a1   :  { %s347_s29 = smov 128   ;;  %s348_s30 = smov 8   ;;  %v182_v26 = vcvt.f32.s32 %v176_v19  ;;  %v197_v29 = vcvt.f32.s32 %v191_v23  ;;  %v221_v32 = vsel %vm216_vm11, %v404_v38, 0  ;;  %v222_v39 = vsel %vm216_vm11, %v408_v43, 0 }
 0x3a2   :  { %245 = dma.vmem_to_hbm [thread:$0]  %s240_s1, 256, %s453_s3, [#allocation3], %s347_s29, %s347_s29, %s348_s30  }
 0x3a3   :  { %v183_v28 = vshll.u32 %v182_v26, 16  ;;  %v198_v34 = vshll.u32 %v197_v29, 16  ;;  %s349_s7 = smov [#allocation4]  }
 0x3a4   :  { %s251_s8 = sshll.u32 %s349_s7, 4  ;;  %s252_s8 = int_to_ptr.vmem [resolvable:$true] %s251_s8 }
 0x3a5   :  { %s322_s3 = scalar_lea.vmem %s252_s8, 256  ;;  %p327_p6 = scmp.lt.s32.totalorder %s252_s8, %s252_s8 }
 0x3a6   :  { %p323_p5 = scmp.ne.s32.totalorder %s252_s8, %s322_s3  ;;  %p328_p7 = scmp.lt.s32.totalorder %s322_s3, %s322_s3 }
 0x3a8   :  { %p329_p8 = por %p328_p7, %p327_p6 }
 0x3aa   :  { %p330_p9 = pnand %p329_p8, %p323_p5 }
 0x424   :  { %v180_v27 = vpop.xlane.xlu0 %179 }
 0x425   :  { %v181_v30 = vcvt.f32.s32 %v180_v27 }
 0x427   :  { %v184_v31 = vadd.s32 %v183_v28, %v181_v30 }
 0x428   :  { %v195_v33 = vpop.xlane.xlu1 %194 }
 0x429   :  { %v228_v35 = vsel %vm223_vm10, %v184_v31, %v221_v32  ;;  %v196_v36 = vcvt.f32.s32 %v195_v33 }
 0x42a   :  { %232 = vst [vmem:[#allocation4] sm:$0xff] %v228_v35 }
 0x42b   :  { %v199_v37 = vadd.s32 %v198_v34, %v196_v36 }
 0x42d   :  { %v229_v40 = vsel %vm223_vm10, %v199_v37, %v222_v39 }
 0x42e   :  { %233 = vst [vmem:[#allocation4 + $0x8] sm:$0xff] %v229_v40 }
 0x42f   :  { %333 = shalt.err (!%p330_p9)
}
 0x430   :  { %257 = dma.vmem_to_hbm [thread:$0]  %s252_s8, 256, %s454_s4, [#allocation5], %s347_s29, %s347_s29, %s348_s30  }
 0x431   :  { %342 = dma.done.wait [#allocation3], 256  }
 0x432   :  { %343 = vsyncadd [#allocation3], 4294967040 }
 0x433   :  { %344 = dma.done.wait [#allocation5], 256  }
 0x434   :  { %345 = vsyncadd [#allocation5], 4294967040 }
 0x435   :  { %264 = vsyncpa [#allocation3], 1 }
 0x436   :  { %265 = vsyncpa [#allocation5], 1 }

// kernel: tpu_custom_call.1
= control target key start
LH: loop header
LB: loop body
LE: loop exit
PB: predicated region body
PF: predicated region fallthrough
CT: control target
= control target key end

     0   :  { %10 = vsyncpa [#allocation3], 0  ;;  %vm31_vm0 = vcmask 261120   ;;  %s450_s0 = inlined_call_operand.vmem [shape: f32[16,32], index: 0, kind: input, shape index: {}]   ;;  %s451_s1 = inlined_call_operand.vmem [shape: f32[32,8], index: 1, kind: input, shape index: {}]   ;;  %s452_s2 = inlined_call_operand.vmem [shape: f32[1,8], index: 2, kind: input, shape index: {}]   ;;  %s453_s3 = inlined_call_operand.hbm [shape: f32[16,128], index: 3, kind: output, shape index: {0}]   ;;  %s454_s4 = inlined_call_operand.hbm [shape: s32[16,128], index: 4, kind: output, shape index: {1}]  }
   0x1   :  { %v23_v0 = vld [vmem:[%s451_s1 + $0x18] sm:$0xff]  ;;  %v22_v1 = vld [vmem:[%s451_s1 + $0x10] sm:$0xff]  ;;  %v18_v2 = vld [vmem:[%s450_s0] sm:$0xff] }
   0x2   :  { %275 = vmatprep.subr.mxu0 %v23_v0  ;;  %v21_v3 = vld [vmem:[%s451_s1 + $0x8] sm:$0xff]  ;;  %283 = vmatprep.mubr.msk.f32.mxu0 %vm31_vm0, %v18_v2 }
   0x3   :  { %276 = vmatpush3.msra.mxu0 %v23_v0 }
   0x4   :  { %11 = vsyncpa [#allocation5], 0  ;;  %277 = vmatprep.subr.mxu0 %v22_v1  ;;  %v20_v4 = vld [vmem:[%s451_s1] sm:$0xff]  ;;  %v19_v5 = vld [vmem:[%s450_s0 + $0x8] sm:$0xff]  ;;  %vm115_vm1 = vcmask 64512   ;;  %v113_v13 = vlaneseq  ;;  %s346_s0 = smov [#allocation2]  }
   0x5   :  { %278 = vmatpush3.msra.mxu0 %v22_v1  ;;  %v266_v7 = vld [vmem:[%s452_s2] ss:$0 sm:$0xff]  ;;  %s239_s1 = sshll.u32 %s346_s0, 4  ;;  %s240_s1 = int_to_ptr.vmem [resolvable:$true] %s239_s1 }
   0x6   :  { %279 = vmatprep.subr.mxu0 %v21_v3  ;;  %v398_v14 = vand.u32 127, %v113_v13  ;;  %s302_s2 = scalar_lea.vmem %s240_s1, 256  ;;  %p307_p1 = scmp.lt.s32.totalorder %s240_s1, %s240_s1 }
   0x7   :  { %280 = vmatpush3.msra.mxu0 %v21_v3  ;;  %p303_p0 = scmp.ne.s32.totalorder %s240_s1, %s302_s2  ;;  %p308_p2 = scmp.lt.s32.totalorder %s302_s2, %s302_s2 }
   0x8   :  { %281 = vmatprep.subr.mxu0 %v20_v4  ;;  %vm223_vm10 = vcmp.eq.s32.totalorder %v398_v14, 1  ;;  %vm216_vm11 = vcmp.eq.s32.totalorder %v398_v14, 0 }
   0x9   :  { %282 = vmatpush3.msra.mxu0 %v20_v4  ;;  %p309_p3 = por %p308_p2, %p307_p1 }
   0xa   :  { %284 = vmatmul.mubr.msk.f32.vlgmr.msra.gmra.mxu0 %vm31_vm0, %v19_v5 }
   0xb   :  { %p310_p4 = pnand %p309_p3, %p303_p0 }
  0xca   :  { %v285_v6 = vpop.f32.mrf.mxu0 }
  0xcb   :  { %v110_v10 = vadd.f32 %v285_v6, %v266_v7 }
  0xcc   :  { %v104_v8 = vpop.f32.mrf.mxu0 }
  0xcd   :  { %v105_v9 = vadd.f32 %v266_v7, %v104_v8  ;;  %v119_v12 = vsel %vm115_vm1, %v110_v10, -inf }
  0xcf   :  { %v116_v11 = vsel %vm115_vm1, %v105_v9, -inf }
  0xd0   :  { %117 = vmax.xlane.f32.xlu0 %v116_v11 }
  0xd4   :  { %120 = vmax.xlane.f32.xlu0 %v119_v12 }
 0x159   :  { %v118_v15 = vpop.xlane.xlu0 %117 }
 0x15a   :  { %vm122_vm2 = vcmp.eq.f32.partialorder %v105_v9, %v118_v15  ;;  %v200_v47 = vsub.f32 %v118_v15, %v118_v15 }
 0x15b   :  { %v124_v16 = vsel %vm122_vm2, %v398_v14, 8 }
 0x15c   :  { %v126_v17 = vsel %vm115_vm1, %v124_v16, 2147483647  ;;  %v202_v48 = vmul.f32 1.442695, %v200_v47 }
 0x15d   :  { %v121_v18 = vpop.xlane.xlu0 %120  ;;  %v128_v19 = vshra.s32 %v126_v17, 16  ;;  %v127_v25 = vand.u32 65535, %v126_v17 }
 0x15e   :  { %vm123_vm3 = vcmp.eq.f32.partialorder %v110_v10, %v121_v18  ;;  %v201_v49 = vsub.f32 %v121_v18, %v121_v18  ;;  %290 = vpow2.f32 %v202_v48 }
 0x15f   :  { %v130_v20 = vcvt.s32.f32 %v128_v19  ;;  %v125_v21 = vsel %vm123_vm3, %v398_v14, 8  ;;  %v129_v27 = vcvt.s32.f32 %v127_v25 }
 0x160   :  { %v141_v22 = vsel %vm115_vm1, %v125_v21, 2147483647  ;;  %v204_v55 = vmul.f32 1.442695, %v201_v49 }
 0x161   :  { %131 = vmin.xlane.f32.xlu1 %v130_v20  ;;  %v143_v23 = vshra.s32 %v141_v22, 16  ;;  %v142_v28 = vand.u32 65535, %v141_v22 }
 0x163   :  { %v145_v24 = vcvt.s32.f32 %v143_v23  ;;  %v144_v31 = vcvt.s32.f32 %v142_v28 }
 0x165   :  { %146 = vmin.xlane.f32.xlu1 %v145_v24 }
 0x16b   :  { %v291_v1 = vpop.eup %290 }
 0x1ea   :  { %v132_v26 = vpop.xlane.xlu1 %131 }
 0x1eb   :  { %vm133_vm4 = vcmp.eq.f32.partialorder %v130_v20, %v132_v26  ;;  %v138_v33 = vcvt.f32.s32 %v132_v26 }
 0x1ec   :  { %v134_v29 = vsel %vm133_vm4, %v129_v27, inf }
 0x1ed   :  { %135 = vmin.xlane.f32.xlu0 %v134_v29  ;;  %v139_v35 = vshll.u32 %v138_v33, 16 }
 0x1ee   :  { %v147_v30 = vpop.xlane.xlu1 %146 }
 0x1ef   :  { %vm148_vm5 = vcmp.eq.f32.partialorder %v145_v24, %v147_v30  ;;  %v153_v36 = vcvt.f32.s32 %v147_v30 }
 0x1f0   :  { %v149_v32 = vsel %vm148_vm5, %v144_v31, inf }
 0x1f1   :  { %150 = vmin.xlane.f32.xlu1 %v149_v32  ;;  %v154_v40 = vshll.u32 %v153_v36, 16 }
 0x276   :  { %v136_v34 = vpop.xlane.xlu0 %135 }
 0x277   :  { %v137_v37 = vcvt.f32.s32 %v136_v34 }
 0x279   :  { %v404_v38 = vadd.s32 %v139_v35, %v137_v37 }
 0x27a   :  { %v151_v39 = vpop.xlane.xlu1 %150 }
 0x27b   :  { %v152_v41 = vcvt.f32.s32 %v151_v39  ;;  %vm156_vm6 = vcmp.eq.s32.totalorder %v398_v14, %v404_v38 }
 0x27c   :  { %v158_v42 = vsel %vm156_vm6, -inf, %v105_v9 }
 0x27d   :  { %v408_v43 = vadd.s32 %v154_v40, %v152_v41  ;;  %v160_v44 = vsel %vm115_vm1, %v158_v42, -inf }
 0x27e   :  { %161 = vmax.xlane.f32.xlu0 %v160_v44 }
 0x27f   :  { %vm157_vm7 = vcmp.eq.s32.totalorder %v398_v14, %v408_v43 }
 0x280   :  { %v159_v45 = vsel %vm157_vm7, -inf, %v110_v10 }
 0x281   :  { %v163_v46 = vsel %vm115_vm1, %v159_v45, -inf }
 0x282   :  { %164 = vmax.xlane.f32.xlu1 %v163_v46 }
 0x307   :  { %v162_v50 = vpop.xlane.xlu0 %161 }
 0x308   :  { %vm166_vm8 = vcmp.eq.f32.partialorder %v158_v42, %v162_v50  ;;  %v206_v51 = vsub.f32 %v162_v50, %v118_v15 }
 0x309   :  { %v168_v52 = vsel %vm166_vm8, %v398_v14, 8 }
 0x30a   :  { %v208_v53 = vmul.f32 1.442695, %v206_v51  ;;  %v170_v54 = vsel %vm115_vm1, %v168_v52, 2147483647 }
 0x30b   :  { %v165_v56 = vpop.xlane.xlu1 %164  ;;  %v172_v57 = vshra.s32 %v170_v54, 16 }
 0x30c   :  { %292 = vpow2.f32 %v208_v53  ;;  %vm167_vm9 = vcmp.eq.f32.partialorder %v159_v45, %v165_v56  ;;  %v207_v58 = vsub.f32 %v165_v56, %v121_v18  ;;  %v171_v18 = vand.u32 65535, %v170_v54 }
 0x30d   :  { %v169_v59 = vsel %vm167_vm9, %v398_v14, 8  ;;  %v174_v60 = vcvt.s32.f32 %v172_v57  ;;  %294 = vpow2.f32 %v204_v55 }
 0x30e   :  { %v210_v61 = vmul.f32 1.442695, %v207_v58  ;;  %v185_v62 = vsel %vm115_vm1, %v169_v59, 2147483647  ;;  %v173_v20 = vcvt.s32.f32 %v171_v18 }
 0x30f   :  { %175 = vmin.xlane.f32.xlu0 %v174_v60  ;;  %v187_v63 = vshra.s32 %v185_v62, 16  ;;  %v186_v21 = vand.u32 65535, %v185_v62 }
 0x310   :  { %296 = vpow2.f32 %v210_v61 }
 0x311   :  { %v189_v0 = vcvt.s32.f32 %v187_v63  ;;  %v188_v24 = vcvt.s32.f32 %v186_v21 }
 0x313   :  { %190 = vmin.xlane.f32.xlu1 %v189_v0 }
 0x319   :  { %v293_v2 = vpop.eup %292 }
 0x31a   :  { %v212_v3 = vadd.f32 %v293_v2, %v291_v1  ;;  %v295_v4 = vpop.eup %294 }
 0x31c   :  { %298 = vrcp.f32 %v212_v3 }
 0x31d   :  { %v297_v5 = vpop.eup %296 }
 0x31e   :  { %v213_v6 = vadd.f32 %v297_v5, %v295_v4 }
 0x320   :  { %300 = vrcp.f32 %v213_v6 }
 0x329   :  { %v299_v7 = vpop.eup %298 }
 0x32a   :  { %v217_v8 = vmul.f32 %v299_v7, %v291_v1  ;;  %v224_v9 = vmul.f32 %v299_v7, %v293_v2 }
 0x32c   :  { %v219_v10 = vsel %vm216_vm11, %v217_v8, 0.0 }
 0x32d   :  { %v301_v11 = vpop.eup %300  ;;  %v226_v12 = vsel %vm223_vm10, %v224_v9, %v219_v10 }
 0x32e   :  { %v218_v13 = vmul.f32 %v301_v11, %v295_v4  ;;  %v225_v15 = vmul.f32 %v301_v11, %v297_v5  ;;  %230 = vst [vmem:[#allocation2] sm:$0xff] %v226_v12 }
 0x330   :  { %v220_v16 = vsel %vm216_vm11, %v218_v13, 0.0 }
 0x331   :  { %v227_v17 = vsel %vm223_vm10, %v225_v15, %v220_v16 }
 0x332   :  { %231 = vst [vmem:[#allocation2 + $0x8] sm:$0xff] %v227_v17 }
 0x398   :  { %v176_v19 = vpop.xlane.xlu0 %175 }
 0x399   :  { %vm177_vm12 = vcmp.eq.f32.partialorder %v174_v60, %v176_v19 }
 0x39a   :  { %v178_v22 = vsel %vm177_vm12, %v173_v20, inf }
 0x39b   :  { %179 = vmin.xlane.f32.xlu0 %v178_v22 }
 0x39c   :  { %v191_v23 = vpop.xlane.xlu1 %190 }
 0x39d   :  { %vm192_vm13 = vcmp.eq.f32.partialorder %v189_v0, %v191_v23 }
 0x39e   :  { %v193_v25 = vsel %vm192_vm13, %v188_v24, inf }
 0x39f   :  { %194 = vmin.xlane.f32.xlu1 %v193_v25 }
 0x3a0   :  { %313 = shalt.err (!%p310_p4)
}
 0x3a1   :  { %s347_s29 = smov 128   ;;  %s348_s30 = smov 8   ;;  %v182_v26 = vcvt.f32.s32 %v176_v19  ;;  %v197_v29 = vcvt.f32.s32 %v191_v23  ;;  %v221_v32 = vsel %vm216_vm11, %v404_v38, 0  ;;  %v222_v39 = vsel %vm216_vm11, %v408_v43, 0 }
 0x3a2   :  { %245 = dma.vmem_to_hbm [thread:$0]  %s240_s1, 256, %s453_s3, [#allocation3], %s347_s29, %s347_s29, %s348_s30  }
 0x3a3   :  { %v183_v28 = vshll.u32 %v182_v26, 16  ;;  %v198_v34 = vshll.u32 %v197_v29, 16  ;;  %s349_s7 = smov [#allocation4]  }
 0x3a4   :  { %s251_s8 = sshll.u32 %s349_s7, 4  ;;  %s252_s8 = int_to_ptr.vmem [resolvable:$true] %s251_s8 }
 0x3a5   :  { %s322_s3 = scalar_lea.vmem %s252_s8, 256  ;;  %p327_p6 = scmp.lt.s32.totalorder %s252_s8, %s252_s8 }
 0x3a6   :  { %p323_p5 = scmp.ne.s32.totalorder %s252_s8, %s322_s3  ;;  %p328_p7 = scmp.lt.s32.totalorder %s322_s3, %s322_s3 }
 0x3a8   :  { %p329_p8 = por %p328_p7, %p327_p6 }
 0x3aa   :  { %p330_p9 = pnand %p329_p8, %p323_p5 }
 0x424   :  { %v180_v27 = vpop.xlane.xlu0 %179 }
 0x425   :  { %v181_v30 = vcvt.f32.s32 %v180_v27 }
 0x427   :  { %v184_v31 = vadd.s32 %v183_v28, %v181_v30 }
 0x428   :  { %v195_v33 = vpop.xlane.xlu1 %194 }
 0x429   :  { %v228_v35 = vsel %vm223_vm10, %v184_v31, %v221_v32  ;;  %v196_v36 = vcvt.f32.s32 %v195_v33 }
 0x42a   :  { %232 = vst [vmem:[#allocation4] sm:$0xff] %v228_v35 }
 0x42b   :  { %v199_v37 = vadd.s32 %v198_v34, %v196_v36 }
 0x42d   :  { %v229_v40 = vsel %vm223_vm10, %v199_v37, %v222_v39 }
 0x42e   :  { %233 = vst [vmem:[#allocation4 + $0x8] sm:$0xff] %v229_v40 }
 0x42f   :  { %333 = shalt.err (!%p330_p9)
}
 0x430   :  { %257 = dma.vmem_to_hbm [thread:$0]  %s252_s8, 256, %s454_s4, [#allocation5], %s347_s29, %s347_s29, %s348_s30  }
 0x431   :  { %342 = dma.done.wait [#allocation3], 256  }
 0x432   :  { %343 = vsyncadd [#allocation3], 4294967040 }
 0x433   :  { %344 = dma.done.wait [#allocation5], 256  }
 0x434   :  { %345 = vsyncadd [#allocation5], 4294967040 }
 0x435   :  { %264 = vsyncpa [#allocation3], 1 }
 0x436   :  { %265 = vsyncpa [#allocation5], 1 }

</bundles_post_ra>
